<compile_context>
chip_gen: v5e
topology: v5e:2x2
jax: 0.10.0
libtpu: 0.0.40
codegen_flags: <defaults>
</compile_context>

<pallas_src>
import functools
import math

import jax
import jax.numpy as jnp
from jax.experimental import pallas as pl
from jax.experimental.pallas import tpu as pltpu

NEG_INF = -1e30                      # finite "minus infinity": keeps the online softmax NaN-free
VMEM_LIMIT = 64 * 1024 * 1024        # explicit scoped-VMEM cap (default is 32 MiB on v6e/v7x)


def _round_up(x, m):
    return ((x + m - 1) // m) * m


def _pick_row_tile(m, tm_max):
    """Sublane-aligned row tile; keep >=2 tiles so a parallel grid axis can feed both v7x TCs."""
    tm = min(tm_max, _round_up(m, 8))
    if m > 8 and _round_up(m, tm) // tm < 2:
        tm = _round_up((m + 1) // 2, 8)
    return tm


def _pick_col_tile(n, tn_max):
    """Full width if small, else the largest multiple-of-128 divisor of n that is <= tn_max."""
    if n <= tn_max:
        return n
    t = (tn_max // 128) * 128
    while t >= 128 and n % t != 0:
        t -= 128
    return t if t >= 128 else n


# ---------------------------------------------------------------------------
# Kernel 1: row/col-tiled Linear  y = x @ W + b   (W resident per N-tile, bf16)
# ---------------------------------------------------------------------------
def _linear_kernel(x_ref, w_ref, b_ref, o_ref, *, guard_nan):
    x = x_ref[...]
    if guard_nan:
        # torch: nan_to_num only when a NaN is present; elementwise select is equivalent for NaNs.
        x = jnp.where(jnp.isnan(x), 0.0, x)
    acc = jnp.dot(x.astype(jnp.bfloat16), w_ref[...],
                  preferred_element_type=jnp.float32)
    o_ref[...] = (acc + b_ref[...]).astype(o_ref.dtype)


def linear_pallas(x2d, w, b, *, guard_nan_input=False, tm_max=512, tn_max=512):
    """x2d: (M, K) f32; w: (K, N); b: (N,). Returns (M, N) f32."""
    M, K = x2d.shape
    N = w.shape[1]
    tm = _pick_row_tile(M, tm_max)
    tn = _pick_col_tile(N, tn_max)
    Mp = _round_up(M, tm)
    if Mp != M:
        x2d = jnp.pad(x2d, ((0, Mp - M), (0, 0)))
    kernel = functools.partial(_linear_kernel, guard_nan=guard_nan_input)
    out = pl.pallas_call(
        kernel,
        out_shape=jax.ShapeDtypeStruct((Mp, N), jnp.float32),
        grid_spec=pltpu.PrefetchScalarGridSpec(
            num_scalar_prefetch=0,
            grid=(Mp // tm, N // tn),
            in_specs=[
                pl.BlockSpec((tm, K), lambda i, j: (i, 0)),    # activation rows
                pl.BlockSpec((K, tn), lambda i, j: (0, j)),    # bf16 weight column-tile
                pl.BlockSpec((1, tn), lambda i, j: (0, j)),    # bias column-tile
            ],
            out_specs=pl.BlockSpec((tm, tn), lambda i, j: (i, j)),
        ),
        compiler_params=pltpu.CompilerParams(
            dimension_semantics=("parallel", "parallel"),
            vmem_limit_bytes=VMEM_LIMIT),
    )(x2d, w.astype(jnp.bfloat16), b.reshape(1, N).astype(jnp.float32))
    return out[:M]


# ---------------------------------------------------------------------------
# Kernel 2: causal flash attention over (B*H, T, D), bf16 operands, f32 accumulation
# ---------------------------------------------------------------------------
def _flash_attn_kernel(q_ref, k_ref, v_ref, o_ref, m_sc, l_sc, acc_sc,
                       *, scale, tq, tk):
    qi = pl.program_id(1)
    ki = pl.program_id(2)

    @pl.when(ki == 0)
    def _init():
        m_sc[...] = jnp.full_like(m_sc, NEG_INF)
        l_sc[...] = jnp.zeros_like(l_sc)
        acc_sc[...] = jnp.zeros_like(acc_sc)

    def _update(apply_mask):
        q = q_ref[...]                                       # bf16
        k = k_ref[...]                                       # bf16
        s = jax.lax.dot_general(q, k, (((1,), (1,)), ((), ())),
                                preferred_element_type=jnp.float32) * scale
        if apply_mask:
            # Diagonal tile only (tq == tk): global row/col offsets cancel, local iotas suffice.
            rows = jax.lax.broadcasted_iota(jnp.int32, (tq, tk), 0)
            cols = jax.lax.broadcasted_iota(jnp.int32, (tq, tk), 1)
            s = jnp.where(cols <= rows, s, NEG_INF)
        m_prev = m_sc[...]
        m_new = jnp.maximum(m_prev, s.max(axis=-1, keepdims=True))
        alpha = jnp.exp(m_prev - m_new)
        p = jnp.exp(s - m_new)
        l_sc[...] = alpha * l_sc[...] + p.sum(axis=-1, keepdims=True)
        acc_sc[...] = alpha * acc_sc[...] + jnp.dot(
            p.astype(v_ref.dtype), v_ref[...], preferred_element_type=jnp.float32)
        m_sc[...] = m_new

    @pl.when(ki < qi)          # strictly below the diagonal: no mask needed
    def _off_diag():
        _update(apply_mask=False)

    @pl.when(ki == qi)         # diagonal tile: apply the causal mask
    def _diag():
        _update(apply_mask=True)

    # ki > qi: causal-future tile -> no compute (its K/V DMA is also elided by the
    # clamped index_map, which re-uses the ki == qi block).

    @pl.when(ki == pl.num_programs(2) - 1)
    def _finalize():
        inv_l = pl.reciprocal(l_sc[...], approx=True)        # EUP slot, ~free
        o_ref[...] = (acc_sc[...] * inv_l).astype(o_ref.dtype)


def flash_attention_pallas(q, k, v, scale, *, t_max=256):
    """q, k, v: (BH, T, D) bf16. Causal attention; returns (BH, T, D) f32."""
    BH, T, D = q.shape
    t = min(t_max, _round_up(T, 8))
    Tp = _round_up(T, t)
    if Tp != T:
        pad = ((0, 0), (0, Tp - T), (0, 0))
        q, k, v = jnp.pad(q, pad), jnp.pad(k, pad), jnp.pad(v, pad)
    nt = Tp // t

    kernel = functools.partial(_flash_attn_kernel, scale=scale, tq=t, tk=t)
    out = pl.pallas_call(
        kernel,
        out_shape=jax.ShapeDtypeStruct((BH, Tp, D), jnp.float32),
        grid_spec=pltpu.PrefetchScalarGridSpec(
            num_scalar_prefetch=0,
            grid=(BH, nt, nt),
            in_specs=[
                pl.BlockSpec((None, t, D), lambda b, qi, ki: (b, qi, 0)),
                # Clamp to the causal range: future k/v tiles re-use the diagonal block
                # instead of being DMA'd and discarded.
                pl.BlockSpec((None, t, D), lambda b, qi, ki: (b, jnp.minimum(ki, qi), 0)),
                pl.BlockSpec((None, t, D), lambda b, qi, ki: (b, jnp.minimum(ki, qi), 0)),
            ],
            out_specs=pl.BlockSpec((None, t, D), lambda b, qi, ki: (b, qi, 0)),
            scratch_shapes=[
                pltpu.VMEM((t, 1), jnp.float32),   # running max
                pltpu.VMEM((t, 1), jnp.float32),   # running denom
                pltpu.VMEM((t, D), jnp.float32),   # output accumulator
            ],
        ),
        compiler_params=pltpu.CompilerParams(
            dimension_semantics=("parallel", "parallel", "arbitrary"),
            vmem_limit_bytes=VMEM_LIMIT),
    )(q, k, v)
    return out[:, :T, :]


# ---------------------------------------------------------------------------
# Kernel 3: fused c_proj + Compressor (3 chained matmuls, weights resident in bf16)
#           with the output NaN guard applied between proj and compressor.
# ---------------------------------------------------------------------------
def _proj_compressor_kernel(y_ref, wp_ref, bp_ref, wc_ref, bc_ref, we_ref, be_ref, o_ref):
    y = y_ref[...].astype(jnp.bfloat16)
    proj = jnp.dot(y, wp_ref[...], preferred_element_type=jnp.float32) + bp_ref[...]
    proj = jnp.where(jnp.isnan(proj), 0.0, proj)             # module's output NaN guard
    comp = jnp.dot(proj.astype(jnp.bfloat16), wc_ref[...],
                   preferred_element_type=jnp.float32) + bc_ref[...]
    out = jnp.dot(comp.astype(jnp.bfloat16), we_ref[...],
                  preferred_element_type=jnp.float32) + be_ref[...]
    o_ref[...] = out.astype(o_ref.dtype)


def proj_compressor_pallas(y2d, w_proj, b_proj, w_comp, b_comp, w_exp, b_exp, *, tm_max=512):
    M, C = y2d.shape
    cdim = w_comp.shape[1]
    tm = _pick_row_tile(M, tm_max)
    Mp = _round_up(M, tm)
    if Mp != M:
        y2d = jnp.pad(y2d, ((0, Mp - M), (0, 0)))
    out = pl.pallas_call(
        _proj_compressor_kernel,
        out_shape=jax.ShapeDtypeStruct((Mp, C), jnp.float32),
        grid_spec=pltpu.PrefetchScalarGridSpec(
            num_scalar_prefetch=0,
            grid=(Mp // tm,),
            in_specs=[
                pl.BlockSpec((tm, C), lambda i: (i, 0)),
                pl.BlockSpec((C, C), lambda i: (0, 0)),
                pl.BlockSpec((1, C), lambda i: (0, 0)),
                pl.BlockSpec((C, cdim), lambda i: (0, 0)),
                pl.BlockSpec((1, cdim), lambda i: (0, 0)),
                pl.BlockSpec((cdim, C), lambda i: (0, 0)),
                pl.BlockSpec((1, C), lambda i: (0, 0)),
            ],
            out_specs=pl.BlockSpec((tm, C), lambda i: (i, 0)),
        ),
        compiler_params=pltpu.CompilerParams(
            dimension_semantics=("parallel",),
            vmem_limit_bytes=VMEM_LIMIT),
    )(y2d,
      w_proj.astype(jnp.bfloat16), b_proj.reshape(1, C).astype(jnp.float32),
      w_comp.astype(jnp.bfloat16), b_comp.reshape(1, cdim).astype(jnp.float32),
      w_exp.astype(jnp.bfloat16), b_exp.reshape(1, C).astype(jnp.float32))
    return out[:M]


# ---------------------------------------------------------------------------
# RoPE helpers (exact replication of the module's math, including the use of
# the already-rotated component in the second line).
# ---------------------------------------------------------------------------
def precompute_rope_cache(dim, seq_len, theta=10000.0):
    position = jnp.arange(seq_len, dtype=jnp.float32)
    dim_pos = jnp.arange(0, dim, 2, dtype=jnp.float32)
    freq = 1.0 / theta ** (dim_pos / dim)
    angles = jnp.outer(position, freq)
    return jnp.stack([jnp.cos(angles), jnp.sin(angles)], axis=-1)  # (T, dim//2, 2)


def apply_rope(x, rope_cache):
    # x: (B, H, T, D); rope_cache: (T, D//2, 2)
    T, half = rope_cache.shape[0], rope_cache.shape[1]
    x_rot = x[..., 0::2]
    x_pass = x[..., 1::2]
    cos = rope_cache[..., 0].reshape(1, 1, T, half)
    sin = rope_cache[..., 1].reshape(1, 1, T, half)
    x_rot_new = x_rot * cos - x_pass * sin
    x_pass_new = x_pass * cos + x_rot_new * sin   # note: uses NEW x_rot (as in the module)
    return jnp.stack((x_rot_new, x_pass_new), axis=-1).reshape(x.shape)


# ---------------------------------------------------------------------------
# Full forward pass
# ---------------------------------------------------------------------------
def causal_self_attention_forward(x, params, n_head):
    B, T, C = x.shape
    H = n_head
    D = C // H
    scale = 1.0 / math.sqrt(D)

    # QKV projection (Pallas); the input NaN guard is fused into the kernel.
    qkv = linear_pallas(x.reshape(B * T, C), params["w_attn"], params["b_attn"],
                        guard_nan_input=True)
    qkv = qkv.reshape(B, T, 3 * C)
    q, k, v = jnp.split(qkv, 3, axis=2)
    q = jnp.transpose(q.reshape(B, T, H, D), (0, 2, 1, 3))
    k = jnp.transpose(k.reshape(B, T, H, D), (0, 2, 1, 3))
    v = jnp.transpose(v.reshape(B, T, H, D), (0, 2, 1, 3))

    # RoPE + clamp: cheap elementwise, done in JAX (f32), then cast to bf16 for the MXU.
    rope = precompute_rope_cache(D, max(T, 32))[:T]
    q = jnp.clip(apply_rope(q, rope), -100.0, 100.0)
    k = jnp.clip(apply_rope(k, rope), -100.0, 100.0)
    v = jnp.clip(v, -100.0, 100.0)

    # Causal flash attention (Pallas, bf16 operands / f32 accumulation).
    o = flash_attention_pallas(q.reshape(B * H, T, D).astype(jnp.bfloat16),
                               k.reshape(B * H, T, D).astype(jnp.bfloat16),
                               v.reshape(B * H, T, D).astype(jnp.bfloat16), scale)
    y = jnp.transpose(o.reshape(B, H, T, D), (0, 2, 1, 3)).reshape(B * T, C)

    # Fused c_proj + NaN guard + Compressor (single Pallas kernel).
    y = proj_compressor_pallas(y,
                               params["w_proj"], params["b_proj"],
                               params["w_comp"], params["b_comp"],
                               params["w_exp"], params["b_exp"])
    return y.reshape(B, T, C)


# ---------------------------------------------------------------------------
# Pure-JAX reference (mirrors the PyTorch module) and demo
# ---------------------------------------------------------------------------
def _reference_forward(x, params, n_head):
    hi = jax.lax.Precision.HIGHEST
    B, T, C = x.shape
    H = n_head
    D = C // H
    scale = 1.0 / math.sqrt(D)
    x = jnp.nan_to_num(x, nan=0.0)
    qkv = jnp.dot(x.reshape(B * T, C), params["w_attn"], precision=hi) + params["b_attn"]
    q, k, v = jnp.split(qkv.reshape(B, T, 3 * C), 3, axis=2)
    q = jnp.transpose(q.reshape(B, T, H, D), (0, 2, 1, 3))
    k = jnp.transpose(k.reshape(B, T, H, D), (0, 2, 1, 3))
    v = jnp.transpose(v.reshape(B, T, H, D), (0, 2, 1, 3))
    rope = precompute_rope_cache(D, max(T, 32))[:T]
    q = jnp.clip(apply_rope(q, rope), -100.0, 100.0)
    k = jnp.clip(apply_rope(k, rope), -100.0, 100.0)
    v = jnp.clip(v, -100.0, 100.0)
    att = jnp.einsum("bhqd,bhkd->bhqk", q, k, precision=hi) * scale
    mask = jnp.tril(jnp.ones((T, T), dtype=bool))
    att = jnp.where(mask[None, None], att, -jnp.inf)
    att = jax.nn.softmax(att, axis=-1)
    y = jnp.einsum("bhqk,bhkd->bhqd", att, v, precision=hi)
    y = jnp.transpose(y, (0, 2, 1, 3)).reshape(B * T, C)
    y = jnp.dot(y, params["w_proj"], precision=hi) + params["b_proj"]
    y = jnp.dot(y, params["w_comp"], precision=hi) + params["b_comp"]
    y = jnp.dot(y, params["w_exp"], precision=hi) + params["b_exp"]
    return y.reshape(B, T, C)


def _linear_init(key, fan_in, fan_out, w_std=None):
    kw, kb = jax.random.split(key)
    bound = 1.0 / math.sqrt(fan_in)
    if w_std is None:
        w = jax.random.uniform(kw, (fan_in, fan_out), jnp.float32, -bound, bound)
    else:
        w = w_std * jax.random.normal(kw, (fan_in, fan_out), jnp.float32)
    b = jax.random.uniform(kb, (fan_out,), jnp.float32, -bound, bound)
    return w, b


if __name__ == "__main__":
    # Small config consistent with the module.
    n_embd, n_head, n_layer = 32, 4, 2
    batch, seq = 2, 8
    comp_dim = n_embd // 2

    key = jax.random.PRNGKey(0)
    kx, k1, k2, k3, k4 = jax.random.split(key, 5)

    x = jax.random.normal(kx, (batch, seq, n_embd), jnp.float32)

    w_attn, b_attn = _linear_init(k1, n_embd, 3 * n_embd, w_std=0.02)
    w_proj, b_proj = _linear_init(k2, n_embd, n_embd, w_std=0.02 / math.sqrt(2 * n_layer))
    w_comp, b_comp = _linear_init(k3, n_embd, comp_dim)
    w_exp, b_exp = _linear_init(k4, comp_dim, n_embd)
    params = dict(w_attn=w_attn, b_attn=b_attn, w_proj=w_proj, b_proj=b_proj,
                  w_comp=w_comp, b_comp=b_comp, w_exp=w_exp, b_exp=b_exp)

    out = causal_self_attention_forward(x, params, n_head)
    out = jax.block_until_ready(out)

    ref = _reference_forward(x, params, n_head)
    assert out.shape == ref.shape
    # bf16 MXU operands (f32 accumulation) vs. an f32 HIGHEST-precision reference
    # -> tolerance loosened accordingly.
    assert jnp.allclose(out, ref, atol=2e-2, rtol=2e-2), "mismatch vs reference"

    print("KERNEL_OK")
</pallas_src>

<mosaic_0001>
module attributes {stable_mosaic.version = 11 : i64} {
  func.func @_linear_kernel(%arg0: i32, %arg1: i32, %arg2: memref<8x32xf32, #tpu.memory_space<vmem>>, %arg3: memref<32x96xbf16, #tpu.memory_space<vmem>>, %arg4: memref<1x96xf32, #tpu.memory_space<vmem>>, %arg5: memref<8x96xf32, #tpu.memory_space<vmem>>) attributes {dimension_semantics = [#tpu.dimension_semantics<parallel>, #tpu.dimension_semantics<parallel>], iteration_bounds = array<i64: 2, 1>, scalar_prefetch = 0 : i64, scratch_operands = 0 : i64, tpu.core_type = #tpu.core_type<tc>, window_params = [{transform_indices = @transform_0, window_bounds = array<i64: 8, 32>}, {transform_indices = @transform_1, window_bounds = array<i64: 32, 96>}, {transform_indices = @transform_2, window_bounds = array<i64: 1, 96>}, {transform_indices = @transform_3, window_bounds = array<i64: 8, 96>}]} {
    %c0 = arith.constant 0 : index
    %c0_0 = arith.constant 0 : index
    %0 = vector.load %arg2[%c0, %c0_0] : memref<8x32xf32, #tpu.memory_space<vmem>>, vector<8x32xf32>
    %1 = arith.cmpf one, %0, %0 : vector<8x32xf32>
    %cst = arith.constant 0.000000e+00 : f32
    %2 = vector.broadcast %cst : f32 to vector<8x32xf32>
    %3 = arith.select %1, %2, %0 : vector<8x32xi1>, vector<8x32xf32>
    %4 = arith.truncf %3 : vector<8x32xf32> to vector<8x32xbf16>
    %c0_1 = arith.constant 0 : index
    %c0_2 = arith.constant 0 : index
    %5 = vector.load %arg3[%c0_1, %c0_2] : memref<32x96xbf16, #tpu.memory_space<vmem>>, vector<32x96xbf16>
    %cst_3 = arith.constant dense<0.000000e+00> : vector<8x96xf32>
    %6 = tpu.matmul %4, %5, %cst_3 {dimension_numbers = #tpu.dot_dimension_numbers<[1], [0], [0], [1], [0, 0, 1, 1], [], []>} : vector<8x32xbf16>, vector<32x96xbf16>, vector<8x96xf32> -> vector<8x96xf32>
    %c0_4 = arith.constant 0 : index
    %c0_5 = arith.constant 0 : index
    %7 = vector.load %arg4[%c0_4, %c0_5] : memref<1x96xf32, #tpu.memory_space<vmem>>, vector<1x96xf32>
    %8 = vector.broadcast %7 : vector<1x96xf32> to vector<8x96xf32>
    %9 = arith.addf %6, %8 : vector<8x96xf32>
    %c0_6 = arith.constant 0 : index
    %c0_7 = arith.constant 0 : index
    %10 = vector.load %arg5[%c0_6, %c0_7] : memref<8x96xf32, #tpu.memory_space<vmem>>, vector<8x96xf32>
    tpu.vector_store %arg5[%c0_6, %c0_7], %9 {strides = array<i32>} : memref<8x96xf32, #tpu.memory_space<vmem>>, vector<8x96xf32>,
    return
  }
  func.func @transform_0(%arg0: i32, %arg1: i32) -> (i32, i32) {
    %c0_i32 = arith.constant 0 : i32
    %c0_i32_0 = arith.constant 0 : i32
    return %arg0, %c0_i32 : i32, i32
  }
  func.func @transform_1(%arg0: i32, %arg1: i32) -> (i32, i32) {
    %c0_i32 = arith.constant 0 : i32
    %c0_i32_0 = arith.constant 0 : i32
    return %c0_i32, %arg1 : i32, i32
  }
  func.func @transform_2(%arg0: i32, %arg1: i32) -> (i32, i32) {
    %c0_i32 = arith.constant 0 : i32
    %c0_i32_0 = arith.constant 0 : i32
    return %c0_i32, %arg1 : i32, i32
  }
  func.func @transform_3(%arg0: i32, %arg1: i32) -> (i32, i32) {
    %c0_i32 = arith.constant 0 : i32
    return %arg0, %arg1 : i32, i32
  }
}

</mosaic_0001>

<bundles_post_ra>
// kernel: tpu_custom_call.1
= control target key start
LH: loop header
LB: loop body
LE: loop exit
PB: predicated region body
PF: predicated region fallthrough
CT: control target
= control target key end

     0   :  { %8 = vsyncpa [#allocation3], 0  ;;  %s824_s0 = inlined_call_operand.hbm [shape: f32[16,32], index: 0, kind: input, shape index: {}]   ;;  %s825_s1 = inlined_call_operand.hbm [shape: bf16[32,96], index: 1, kind: input, shape index: {}]   ;;  %s826_s2 = inlined_call_operand.vmem [shape: f32[1,96], index: 2, kind: input, shape index: {}]   ;;  %s827_s3 = inlined_call_operand.hbm [shape: f32[16,96], index: 3, kind: output, shape index: {}]  }
   0x1   :  { %10 = vsyncpa [#allocation3 + $0x1], 0 }
   0x2   :  { %11 = vsyncpa [#allocation6], 0 }
   0x3   :  { %12 = vsyncpa [#allocation4], 0 }
   0x4   :  { %14 = vsyncpa [#allocation4 + $0x1], 0  ;;  %s678_s12 = smov 0   ;;  %s680_s13 = smov 0  }
   0x5   :  { %s682_s14 = smov 0   ;;  %s684_s15 = smov 0  }
   0x6   :  { %s686_s16 = smov 0   ;;  %s688_s17 = smov 0  }
   0x7 LB: > { %s404_s18 = sadd.s32 4294967295, %s653_s17   ;;  %p406_p0 = scmp.ge.s32.totalorder %s653_s17, 1  ;;  %s653_s17 = sphi %s688_s17, %s20_s17   ;;  %s649_s16 = sphi %s686_s16, %s838_s16   ;;  %s645_s15 = sphi %s684_s15, %s837_s15   ;;  %s641_s14 = sphi %s682_s14, %s836_s14   ;;  %s637_s13 = sphi %s680_s13, %s835_s13   ;;  %s633_s12 = sphi %s678_s12, %s834_s12  }
   0x8   : > { %p710_p1 = scmp.eq.s32.totalorder %s404_s18, 0  ;;  %p143_p2 = scmp.lt.s32.totalorder %s653_s17, 3 }
   0x9   : > { %s156_s22 = sshll.u32 %s825_s1, 4  ;;  %s655_s24 = smov [#allocation5]   ;;  %s157_s22 = int_to_ptr.hbm [resolvable:$true] %s156_s22 }
   0xa   : > { %p718_p3 = pnand %p406_p0, %p143_p2  ;;  %s158_s25 = sshll.u32 %s655_s24, 4  ;;  %s159_s25 = int_to_ptr.vmem [resolvable:$true] %s158_s25 }
   0xb   : > { %p409_p6 = scmp.ge.s32.totalorder %s653_s17, 2  ;;  %s656_s26 = smov 64  }
   0xc   : > { %p439_p4 = pneg %p718_p3  ;;  %s657_s27 = smov 4  }
   0xd   : > { %s405_s28 = sadd.s32 4294967294, %s653_s17   ;;  %s32_s29 = sadd.s32 1, %s649_s16 }
   0xe   : > { %p440_p5 = pnand %p439_p4, %p710_p1  ;;  %s39_s30 = sadd.s32 1, %s641_s14 }
   0xf   : > { %p34_p7 = scmp.ge.s32.totalorder %s32_s29, 2  ;;  %p46_p8 = scmp.ne.s32.totalorder %s641_s14, %s637_s13 }
  0x10   : > { %442 = dma.hbm_to_vmem [thread:$0]  (!%p440_p5), %s157_s22, 256, %s159_s25, [#allocation6], %s656_s26, %s656_s26, %s657_s27  }
  0x11   : > { %p47_p9 = scmp.eq.s32.totalorder %s653_s17, 0  ;;  %p52_p10 = scmp.ne.s32.totalorder %s637_s13, %s633_s12 }
  0x12   : > { %s840_s29 = smov (%p34_p7, %s32_s29), 0  ;;  %p130_p13 = scmp.eq.s32.totalorder %s404_s18, 1 }
  0x13   : > { %p737_p11 = por %p47_p9, %p46_p8  ;;  %p743_p12 = por %p710_p1, %p52_p10 }
  0x14   : > { %s36_s6 = ssub.s32 %s649_s16, %s840_s29  ;;  %p136_p2 = scmp.eq.s32.totalorder %s405_s28, 1 }
  0x15   : > { %p37_p0 = scmp.eq.s32.totalorder %s36_s6, 0  ;;  %p749_p4 = por %p130_p13, %p46_p8 }
  0x16   : > { %p452_p5 = scmp.lt.s32.totalorder %s653_s17, 2  ;;  %p757_p7 = por %p136_p2, %p52_p10 }
  0x17   : > { %s755_s8 = scalar_select %p37_p0, %s641_s14, %s39_s30  }
  0x18   : > { %s178_s10 = sand.u32 1, %s641_s14   ;;  %s411_s20 = sshll.u32 %s649_s16, 3 }
  0x19   : > { %s410_s11 = sshll.u32 %s178_s10, 3  ;;  %s186_s18 = scalar_lea.hbm %s824_s0, %s411_s20 }
  0x1a   : > { %s182_s24 = scalar_lea.vmem [#allocation2], %s410_s11  ;;  %s188_s26 = sshll.u32 %s186_s18, 4  ;;  %s189_s26 = int_to_ptr.hbm [resolvable:$true] %s188_s26 }
  0x1b   : > { %s190_s25 = sshll.u32 %s182_s24, 4  ;;  %p444_p8 = pnand %p452_p5, %p737_p11  ;;  %s191_s25 = int_to_ptr.vmem [resolvable:$true] %s190_s25 }
  0x1c   : > { %s179_s27 = scalar_lea.sflag [#allocation3], %s178_s10  ;;  %199 = sbr.rel (%p718_p3) target bundleno = 178 (0xb2), region = 32 }
  0x1d   : > { %446 = dma.hbm_to_vmem [thread:$0]  (!%p444_p8), %s189_s26, 128, %s191_s25, %s179_s27  }
  0x1e   : > { %s771_s28 = sand.u32 (!%p718_p3), 1, %s637_s13  }
  0x1f   : > { %s413_s30 = sshll.u32 (!%p718_p3), %s771_s28, 3  ;;  %s202_s6 = scalar_lea.sflag (!%p718_p3), [#allocation3], %s771_s28 }
  0x20   : > { %s205_s11 = scalar_lea.vmem (!%p718_p3), [#allocation2], %s413_s30 }
  0x21   : > { %620 = dma.done.wait (%p743_p12), %s202_s6, 128  }
  0x22   : > { %622 = vsyncadd (%p743_p12), %s202_s6, 4294967168 }
  0x23   : > { %624 = dma.done.wait (%p710_p1), [#allocation6], 256  }
  0x24   : > { %626 = vsyncadd (%p710_p1), [#allocation6], 4294967040  ;;  %v430_v0 = vld [vmem:[#allocation5 + $0x8] sm:$0xff]  ;;  %v241_v1 = vld [vmem:[%s205_s11] sm:$0xff]  ;;  %vm265_vm1 = vcmask 261120   ;;  %s426_s23 = sshll.u32 %s645_s15, 3 }
  0x25   : > { %vm242_vm0 = vcmp.ne.f32.partialorder %v241_v1, %v241_v1  ;;  %275 = vmatpush.bf16.msra.mxu0 %v430_v0  ;;  %v429_v2 = vld [vmem:[#allocation5] sm:$0xff]  ;;  %s296_s10 = scalar_lea.hbm %s827_s3, %s426_s23  ;;  %v506_v5 = vld [vmem:[%s826_s2] ss:$0 sm:$0xff]  ;;  %s236_s21 = scalar_lea.vmem [#allocation7], %s413_s30  ;;  %vm282_vm2 = vcmask 785408  }
  0x26   : > { %v243_v3 = vsel %vm242_vm0, 0.0, %v241_v1  ;;  %s298_s22 = sshll.u32 %s236_s21, 4  ;;  %s300_s18 = sshll.u32 %s296_s10, 4  ;;  %s299_s22 = int_to_ptr.vmem [resolvable:$true] %s298_s22  ;;  %s301_s18 = int_to_ptr.hbm [resolvable:$true] %s300_s18 }
  0x27   : > { %v244_v4 = vpack.c.bf16 %v243_v3, %v243_v3  ;;  %s285_s24 = scalar_lea.sflag [#allocation4], %s771_s28  ;;  %s581_s15 = sshra.s32 %s301_s18, 4  ;;  %s582_s15 = int_to_ptr.hbm [resolvable:$true] %s581_s15 }
  0x28   : > { %s583_s25 = scalar_lea.hbm %s582_s15, 8  ;;  %s587_s30 = scalar_lea.hbm %s827_s3, 16 }
  0x29   : > { %276 = vmatpush.bf16.msra.mxu0 %v429_v2  ;;  %p584_p1 = scmp.ne.s32.totalorder %s582_s15, %s583_s25  ;;  %p588_p10 = scmp.lt.s32.totalorder %s582_s15, %s827_s3 }
  0x2a   : > { %p589_p11 = scmp.lt.s32.totalorder %s587_s30, %s583_s25 }
  0x2b   : > { %p585_p3 = pnand %p584_p1, %p749_p4 }
  0x2c   : > { %424 = vmatmul.msk.bf16.vlgmr.msra.gmra.mxu0 %vm265_vm1, %v244_v4  ;;  %p590_p12 = por %p589_p11, %p588_p10 }
  0x2d   : > { %p586_p9 = pneg %p585_p3 }
  0x2f   : > { %p591_p13 = pnand %p590_p12, %p586_p9 }
  0xa9   : > { %v278_v6 = vpop.f32.mrf.mxu0 }
  0xaa   : > { %v279_v7 = vadd.f32 %v506_v5, %v278_v6 }
  0xac   : > { %283 = vst.msk [vmem:[%s236_s21] sm:$0xff] %vm282_vm2, %v279_v7 }
  0xad   : > { %594 = shalt.err (!%p591_p13)
}
  0xae   : > { %437 = dma.vmem_to_hbm [thread:$0]  (%p749_p4), %s299_s22, 128, %s301_s18, %s285_s24  }
  0xb1   : > { %v280_v8 = vpop.f32.mrf.mxu0 }
  0xb2 PF: > { %s312_s28 = sand.u32 1, %s633_s12   ;;  %p448_p0 = pnand %p409_p6, %p757_p7 }
  0xb3   : > { %s313_s23 = scalar_lea.sflag [#allocation4], %s312_s28 }
  0xb4   : > { %p449_p2 = pneg %p448_p0 }
  0xb6   : > { %628 = dma.done.wait (%p449_p2), %s313_s23, 128  }
  0xb7   : > { %630 = vsyncadd (%p449_p2), %s313_s23, 4294967168  ;;  %s20_s17 = sadd.s32 1, %s653_s17   ;;  %s834_s12 = smov %s637_s13 }
  0xb8   : > { %p17_p5 = scmp.ge.s32.totalorder %s20_s17, 4   ;;  %s835_s13 = smov %s641_s14 }
  0xb9   : > { %s836_s14 = smov %s755_s8  ;;  %s837_s15 = smov %s649_s16 }
  0xba   : > { %s838_s16 = smov %s840_s29  ;;  %19 = sbr.rel (!%p17_p5) target bundleno = 7 (0x7), region = 85 }
  0xbf   :  { %319 = vsyncpa [#allocation3], 1 }
  0xc0   :  { %321 = vsyncpa [#allocation3 + $0x1], 1 }
  0xc1   :  { %322 = vsyncpa [#allocation6], 1 }
  0xc2   :  { %323 = vsyncpa [#allocation4], 1 }
  0xc3   :  { %325 = vsyncpa [#allocation4 + $0x1], 1 }

</bundles_post_ra>
